<compile_context>
chip_gen: v7x
topology: tpu7x:2x2x1
jax: 0.10.0
libtpu: 0.0.40
codegen_flags: <defaults>
</compile_context>

<pallas_src>
import functools

import jax
import jax.numpy as jnp
from jax import lax
from jax.experimental import pallas as pl
from jax.experimental.pallas import tpu as pltpu


def _round_up(x, m):
    return (x + m - 1) // m * m


def _encoder_kernel(n_layers, T, V, Hp,
                    tok_ref,      # scalar prefetch (SMEM): (T,) int32 token ids
                    emb_ref,      # VMEM (Vp, Ep)   zero-padded embedding table
                    h0_ref,       # VMEM (1, Hp)    initial hidden
                    wi_ref,       # VMEM (Ep, 3Hp)  fused+padded input weights [r|z|n]
                    wh_ref,       # VMEM (Hp, 3Hp)  fused+padded hidden weights [r|z|n]
                    bi_ref,       # VMEM (1, 3Hp)   input biases (+ folded b_hr, b_hz)
                    bhn_ref,      # VMEM (1, Hp)    b_hn (stays inside r * (...))
                    out_ref,      # VMEM (Tp, Hp)   per-step outputs (resident block)
                    hout_ref,     # VMEM (1, Hp)    final hidden
                    x_ref,        # scratch (Tp, Ep)   gathered embeddings
                    gi_ref):      # scratch (Tp, 3Hp)  batched input projection
    # ---- phase 1: gather the T embedding rows (off the recurrent path) -----
    x_ref[...] = jnp.zeros_like(x_ref)

    def gather(i, carry):
        tok = jnp.clip(tok_ref[i], 0, V - 1)          # in-kernel bounds clamp
        x_ref[pl.ds(i, 1), :] = emb_ref[pl.ds(tok, 1), :]
        return carry

    lax.fori_loop(0, T, gather, 0, unroll=True)

    # ---- phase 2: batched input projection (one MXU pass, M filled) --------
    gi_ref[...] = (jnp.dot(x_ref[...], wi_ref[...],
                           preferred_element_type=jnp.float32)
                   + bi_ref[...])

    # ---- phase 3: sequential recurrence (hidden matmul only) ---------------
    # PyTorch GRU cell (gates fused along lanes, each 128-aligned):
    #   r  = sigmoid(x W_ir + b_ir + h W_hr + b_hr)
    #   z  = sigmoid(x W_iz + b_iz + h W_hz + b_hz)
    #   n  = tanh  (x W_in + b_in + r * (h W_hn + b_hn))
    #   h' = (1 - z) * n + z * h  ==  n + z * (h - n)
    def gru_cell(gi, h):
        gh = jnp.dot(h, wh_ref[...], preferred_element_type=jnp.float32)
        r = jax.nn.sigmoid(gi[:, 0:Hp] + gh[:, 0:Hp])
        z = jax.nn.sigmoid(gi[:, Hp:2 * Hp] + gh[:, Hp:2 * Hp])
        n = jnp.tanh(gi[:, 2 * Hp:] + r * (gh[:, 2 * Hp:] + bhn_ref[...]))
        return n + z * (h - n)

    def step(t, h):
        h = gru_cell(gi_ref[pl.ds(t, 1), :], h)       # layer 0: precomputed gi
        # The module re-applies the same GRU n_layers times (needs E == H);
        # for the deeper passes the input is h, so recompute its projection.
        for _ in range(n_layers - 1):
            gi = (jnp.dot(h, wi_ref[...], preferred_element_type=jnp.float32)
                  + bi_ref[...])
            h = gru_cell(gi, h)
        out_ref[pl.ds(t, 1), :] = h                   # lane-dense resident store
        return h

    h_final = lax.fori_loop(0, T, step, h0_ref[...], unroll=True)
    hout_ref[...] = h_final


def encoder_forward(tokens, hidden, params, *, n_layers=1):
    """Run the Encoder over a token sequence inside one pallas_call.

    tokens: int32 (T,) — T=1 reproduces Encoder.forward(input, hidden) exactly.
    hidden: f32 (1, 1, H) initial hidden.
    Returns (outputs, hidden): outputs (T, 1, H) per-step GRU outputs and
    hidden (1, 1, H) the state after the last step.
    """
    tokens = jnp.asarray(tokens, jnp.int32).reshape(-1)
    T = int(tokens.shape[0])
    emb = params["embedding"]                     # (V, E)
    V, E = emb.shape
    H = int(hidden.shape[-1])
    if n_layers > 1:
        assert E == H, "re-applying the same GRU needs embed_dim == hidden_dim"

    f32 = jnp.float32
    Hp = _round_up(H, 128)                        # 128-lane aligned gates
    Ep = _round_up(E, 128)
    Vp = _round_up(V, 8)
    Tp = _round_up(T, 8)

    # --- host-side parameter packing (done once) ----------------------------
    # TODO(synk): store emb/w_i/w_h in bfloat16 (f32 accumulation) to halve
    # weight HBM/VMEM traffic; kept f32 here to match the PyTorch module.
    emb_p = jnp.zeros((Vp, Ep), f32).at[:V, :E].set(emb.astype(f32))

    w_i = jnp.zeros((Ep, 3 * Hp), f32)
    w_h = jnp.zeros((Hp, 3 * Hp), f32)
    b_i = jnp.zeros((1, 3 * Hp), f32)
    names_i = ("w_ir", "w_iz", "w_in")
    names_h = ("w_hr", "w_hz", "w_hn")
    names_bi = ("b_ir", "b_iz", "b_in")
    names_bh = ("b_hr", "b_hz", "b_hn")
    for g in range(3):
        w_i = w_i.at[:E, g * Hp:g * Hp + H].set(params[names_i[g]].astype(f32))
        w_h = w_h.at[:H, g * Hp:g * Hp + H].set(params[names_h[g]].astype(f32))
        bias = params[names_bi[g]].astype(f32)
        if g < 2:  # fold b_hr / b_hz into the (pre-pass) input bias
            bias = bias + params[names_bh[g]].astype(f32)
        b_i = b_i.at[:, g * Hp:g * Hp + H].set(bias)
    b_hn = jnp.zeros((1, Hp), f32).at[:, :H].set(params["b_hn"].astype(f32))

    h0 = jnp.zeros((1, Hp), f32).at[:, :H].set(hidden.reshape(1, H).astype(f32))

    grid_spec = pltpu.PrefetchScalarGridSpec(
        num_scalar_prefetch=1,
        grid=(1,),                                   # whole sequence in one step
        in_specs=[
            pl.BlockSpec((Vp, Ep), lambda i, tok: (0, 0)),        # embedding table
            pl.BlockSpec((1, Hp), lambda i, tok: (0, 0)),         # h0
            pl.BlockSpec((Ep, 3 * Hp), lambda i, tok: (0, 0)),    # fused W_i
            pl.BlockSpec((Hp, 3 * Hp), lambda i, tok: (0, 0)),    # fused W_h
            pl.BlockSpec((1, 3 * Hp), lambda i, tok: (0, 0)),     # fused b_i
            pl.BlockSpec((1, Hp), lambda i, tok: (0, 0)),         # b_hn
        ],
        out_specs=[
            pl.BlockSpec((Tp, Hp), lambda i, tok: (0, 0)),        # per-step outputs
            pl.BlockSpec((1, Hp), lambda i, tok: (0, 0)),         # final hidden
        ],
        scratch_shapes=[
            pltpu.VMEM((Tp, Ep), f32),       # gathered embeddings
            pltpu.VMEM((Tp, 3 * Hp), f32),   # batched input projection
        ],
    )

    out_seq, h_final = pl.pallas_call(
        functools.partial(_encoder_kernel, n_layers, T, V, Hp),
        out_shape=(jax.ShapeDtypeStruct((Tp, Hp), f32),
                   jax.ShapeDtypeStruct((1, Hp), f32)),
        grid_spec=grid_spec,
        compiler_params=pltpu.CompilerParams(
            dimension_semantics=("arbitrary",)),
    )(tokens, emb_p, h0, w_i, w_h, b_i, b_hn)

    return (out_seq[:T, :H].reshape(T, 1, H),
            h_final[:, :H].reshape(1, 1, H))


def encoder_forward_ref(tokens, hidden, params, *, n_layers=1):
    """Pure-JAX reference: the PyTorch module applied step-by-step over tokens."""
    H = hidden.shape[-1]
    h = hidden.reshape(1, H)
    outs = []
    for tok in jnp.reshape(jnp.asarray(tokens, jnp.int32), (-1,)):
        x = params["embedding"][tok][None, :]
        for _ in range(n_layers):
            r = jax.nn.sigmoid(x @ params["w_ir"] + params["b_ir"]
                               + h @ params["w_hr"] + params["b_hr"])
            z = jax.nn.sigmoid(x @ params["w_iz"] + params["b_iz"]
                               + h @ params["w_hz"] + params["b_hz"])
            n = jnp.tanh(x @ params["w_in"] + params["b_in"]
                         + r * (h @ params["w_hn"] + params["b_hn"]))
            h = (1.0 - z) * n + z * h
            x = h
        outs.append(h)
    out = jnp.stack(outs, axis=0)   # (T, 1, H)
    return out, h.reshape(1, 1, H)


def init_params(key, vocab_size, hidden_dim, embed_dim):
    """Deterministic synthetic parameters (PyTorch-style uniform(-1/sqrt(H), 1/sqrt(H)))."""
    keys = jax.random.split(key, 14)
    bound = 1.0 / jnp.sqrt(jnp.float32(hidden_dim))

    def u(k, shape):
        return jax.random.uniform(k, shape, jnp.float32, -bound, bound)

    return {
        "embedding": jax.random.normal(keys[0], (vocab_size, embed_dim), jnp.float32),
        # weights stored transposed w.r.t. PyTorch: (in_features, H)
        "w_ir": u(keys[1], (embed_dim, hidden_dim)),
        "w_iz": u(keys[2], (embed_dim, hidden_dim)),
        "w_in": u(keys[3], (embed_dim, hidden_dim)),
        "w_hr": u(keys[4], (hidden_dim, hidden_dim)),
        "w_hz": u(keys[5], (hidden_dim, hidden_dim)),
        "w_hn": u(keys[6], (hidden_dim, hidden_dim)),
        "b_ir": u(keys[7], (1, hidden_dim)),
        "b_iz": u(keys[8], (1, hidden_dim)),
        "b_in": u(keys[9], (1, hidden_dim)),
        "b_hr": u(keys[10], (1, hidden_dim)),
        "b_hz": u(keys[11], (1, hidden_dim)),
        "b_hn": u(keys[12], (1, hidden_dim)),
    }


if __name__ == "__main__":
    vocab_size, hidden_dim, embed_dim, n_layers = 16, 32, 32, 1

    key = jax.random.PRNGKey(0)
    pkey, tkey = jax.random.split(key)
    params = init_params(pkey, vocab_size, hidden_dim, embed_dim)

    hidden0 = jnp.zeros((1, 1, hidden_dim), dtype=jnp.float32)   # Encoder.initHidden()

    # --- single step: exactly Encoder.forward(input, hidden) -----------------
    token = jnp.array([3], dtype=jnp.int32)
    out1, h1 = encoder_forward(token, hidden0, params, n_layers=n_layers)
    out1, h1 = jax.block_until_ready((out1, h1))
    out1_ref, h1_ref = encoder_forward_ref(token, hidden0, params, n_layers=n_layers)
    assert out1.shape == (1, 1, hidden_dim) and h1.shape == (1, 1, hidden_dim)
    assert jnp.allclose(out1, out1_ref, atol=1e-5), "single-step output mismatch"
    assert jnp.allclose(h1, h1_ref, atol=1e-5), "single-step hidden mismatch"

    # --- T-step sequence: one kernel launch, recurrence inside ---------------
    tokens = jax.random.randint(tkey, (6,), 0, vocab_size, dtype=jnp.int32)
    outs, hT = encoder_forward(tokens, hidden0, params, n_layers=n_layers)
    outs, hT = jax.block_until_ready((outs, hT))
    outs_ref, hT_ref = encoder_forward_ref(tokens, hidden0, params, n_layers=n_layers)
    assert outs.shape == (6, 1, hidden_dim) and hT.shape == (1, 1, hidden_dim)
    assert jnp.allclose(outs, outs_ref, atol=1e-5), "sequence outputs mismatch"
    assert jnp.allclose(hT, hT_ref, atol=1e-5), "sequence hidden mismatch"

    print("KERNEL_OK")
</pallas_src>

<mosaic_0001>
module attributes {stable_mosaic.version = 11 : i64} {
  func.func @_encoder_kernel(%arg0: i32, %arg1: memref<1xi32, #tpu.memory_space<smem>>, %arg2: memref<16x128xf32, #tpu.memory_space<vmem>>, %arg3: memref<1x128xf32, #tpu.memory_space<vmem>>, %arg4: memref<128x384xf32, #tpu.memory_space<vmem>>, %arg5: memref<128x384xf32, #tpu.memory_space<vmem>>, %arg6: memref<1x384xf32, #tpu.memory_space<vmem>>, %arg7: memref<1x128xf32, #tpu.memory_space<vmem>>, %arg8: memref<8x128xf32, #tpu.memory_space<vmem>>, %arg9: memref<1x128xf32, #tpu.memory_space<vmem>>, %arg10: memref<8x128xf32, #tpu.memory_space<vmem>>, %arg11: memref<8x384xf32, #tpu.memory_space<vmem>>) attributes {dimension_semantics = [#tpu.dimension_semantics<arbitrary>], iteration_bounds = array<i64: 1>, scalar_prefetch = 1 : i64, scratch_operands = 2 : i64, tpu.core_type = #tpu.core_type<tc>, window_params = [{pipeline_mode = #tpu.pipeline_mode<synchronous>, transform_indices = @transform_0, window_bounds = array<i64: 16, 128>}, {pipeline_mode = #tpu.pipeline_mode<synchronous>, transform_indices = @transform_1, window_bounds = array<i64: 1, 128>}, {pipeline_mode = #tpu.pipeline_mode<synchronous>, transform_indices = @transform_2, window_bounds = array<i64: 128, 384>}, {pipeline_mode = #tpu.pipeline_mode<synchronous>, transform_indices = @transform_3, window_bounds = array<i64: 128, 384>}, {pipeline_mode = #tpu.pipeline_mode<synchronous>, transform_indices = @transform_4, window_bounds = array<i64: 1, 384>}, {pipeline_mode = #tpu.pipeline_mode<synchronous>, transform_indices = @transform_5, window_bounds = array<i64: 1, 128>}, {pipeline_mode = #tpu.pipeline_mode<synchronous>, transform_indices = @transform_6, window_bounds = array<i64: 8, 128>}, {pipeline_mode = #tpu.pipeline_mode<synchronous>, transform_indices = @transform_7, window_bounds = array<i64: 1, 128>}]} {
    %cst = arith.constant 0.000000e+00 : f32
    %0 = vector.broadcast %cst : f32 to vector<8x128xf32>
    %c0 = arith.constant 0 : index
    %c0_0 = arith.constant 0 : index
    %1 = vector.load %arg10[%c0, %c0_0] : memref<8x128xf32, #tpu.memory_space<vmem>>, vector<8x128xf32>
    tpu.vector_store %arg10[%c0, %c0_0], %0 {strides = array<i32>} : memref<8x128xf32, #tpu.memory_space<vmem>>, vector<8x128xf32>,
    %c0_i32 = arith.constant 0 : i32
    %2 = arith.index_cast %c0_i32 : i32 to index
    %3 = memref.load %arg1[%2] : memref<1xi32, #tpu.memory_space<smem>>
    %c0_i32_1 = arith.constant 0 : i32
    %c15_i32 = arith.constant 15 : i32
    %4 = arith.maxsi %c0_i32_1, %3 : i32
    %5 = arith.minsi %c15_i32, %4 : i32
    %6 = arith.index_cast %5 : i32 to index
    %c0_2 = arith.constant 0 : index
    %7 = vector.load %arg2[%6, %c0_2] : memref<16x128xf32, #tpu.memory_space<vmem>>, vector<1x128xf32>
    %8 = arith.index_cast %c0_i32 : i32 to index
    %c0_3 = arith.constant 0 : index
    %9 = vector.load %arg10[%8, %c0_3] : memref<8x128xf32, #tpu.memory_space<vmem>>, vector<1x128xf32>
    tpu.vector_store %arg10[%8, %c0_3], %7 {strides = array<i32>} : memref<8x128xf32, #tpu.memory_space<vmem>>, vector<1x128xf32>,
    %c1_i32 = arith.constant 1 : i32
    %c0_4 = arith.constant 0 : index
    %c0_5 = arith.constant 0 : index
    %10 = vector.load %arg10[%c0_4, %c0_5] : memref<8x128xf32, #tpu.memory_space<vmem>>, vector<8x128xf32>
    %c0_6 = arith.constant 0 : index
    %c0_7 = arith.constant 0 : index
    %11 = vector.load %arg4[%c0_6, %c0_7] : memref<128x384xf32, #tpu.memory_space<vmem>>, vector<128x384xf32>
    %cst_8 = arith.constant dense<0.000000e+00> : vector<8x384xf32>
    %12 = tpu.matmul %10, %11, %cst_8 {dimension_numbers = #tpu.dot_dimension_numbers<[1], [0], [0], [1], [0, 0, 1, 1], [], []>} : vector<8x128xf32>, vector<128x384xf32>, vector<8x384xf32> -> vector<8x384xf32>
    %c0_9 = arith.constant 0 : index
    %c0_10 = arith.constant 0 : index
    %13 = vector.load %arg6[%c0_9, %c0_10] : memref<1x384xf32, #tpu.memory_space<vmem>>, vector<1x384xf32>
    %14 = vector.broadcast %13 : vector<1x384xf32> to vector<8x384xf32>
    %15 = arith.addf %12, %14 : vector<8x384xf32>
    %c0_11 = arith.constant 0 : index
    %c0_12 = arith.constant 0 : index
    %16 = vector.load %arg11[%c0_11, %c0_12] : memref<8x384xf32, #tpu.memory_space<vmem>>, vector<8x384xf32>
    tpu.vector_store %arg11[%c0_11, %c0_12], %15 {strides = array<i32>} : memref<8x384xf32, #tpu.memory_space<vmem>>, vector<8x384xf32>,
    %c0_13 = arith.constant 0 : index
    %c0_14 = arith.constant 0 : index
    %17 = vector.load %arg3[%c0_13, %c0_14] : memref<1x128xf32, #tpu.memory_space<vmem>>, vector<1x128xf32>
    %c0_i32_15 = arith.constant 0 : i32
    %18 = arith.index_cast %c0_i32_15 : i32 to index
    %c0_16 = arith.constant 0 : index
    %19 = vector.load %arg11[%18, %c0_16] : memref<8x384xf32, #tpu.memory_space<vmem>>, vector<1x384xf32>
    %c0_17 = arith.constant 0 : index
    %c0_18 = arith.constant 0 : index
    %20 = vector.load %arg5[%c0_17, %c0_18] : memref<128x384xf32, #tpu.memory_space<vmem>>, vector<128x384xf32>
    %cst_19 = arith.constant dense<0.000000e+00> : vector<1x384xf32>
    %21 = tpu.matmul %17, %20, %cst_19 {dimension_numbers = #tpu.dot_dimension_numbers<[1], [0], [0], [1], [0, 0, 1, 1], [], []>} : vector<1x128xf32>, vector<128x384xf32>, vector<1x384xf32> -> vector<1x384xf32>
    %22 = vector.extract_strided_slice %19 {offsets = [0, 0], sizes = [1, 128], strides = [1, 1]} : vector<1x384xf32> to vector<1x128xf32>
    %23 = vector.extract_strided_slice %21 {offsets = [0, 0], sizes = [1, 128], strides = [1, 1]} : vector<1x384xf32> to vector<1x128xf32>
    %24 = arith.addf %22, %23 : vector<1x128xf32>
    %25 = arith.negf %24 : vector<1x128xf32>
    %26 = math.exp %25 : vector<1x128xf32>
    %cst_20 = arith.constant 1.000000e+00 : f32
    %27 = vector.broadcast %cst_20 : f32 to vector<1x128xf32>
    %28 = arith.addf %27, %26 : vector<1x128xf32>
    %29 = arith.divf %27, %28 : vector<1x128xf32>
    %30 = vector.extract_strided_slice %19 {offsets = [0, 128], sizes = [1, 128], strides = [1, 1]} : vector<1x384xf32> to vector<1x128xf32>
    %31 = vector.extract_strided_slice %21 {offsets = [0, 128], sizes = [1, 128], strides = [1, 1]} : vector<1x384xf32> to vector<1x128xf32>
    %32 = arith.addf %30, %31 : vector<1x128xf32>
    %33 = arith.negf %32 : vector<1x128xf32>
    %34 = math.exp %33 : vector<1x128xf32>
    %cst_21 = arith.constant 1.000000e+00 : f32
    %35 = vector.broadcast %cst_21 : f32 to vector<1x128xf32>
    %36 = arith.addf %35, %34 : vector<1x128xf32>
    %37 = arith.divf %35, %36 : vector<1x128xf32>
    %38 = vector.extract_strided_slice %19 {offsets = [0, 256], sizes = [1, 128], strides = [1, 1]} : vector<1x384xf32> to vector<1x128xf32>
    %39 = vector.extract_strided_slice %21 {offsets = [0, 256], sizes = [1, 128], strides = [1, 1]} : vector<1x384xf32> to vector<1x128xf32>
    %c0_22 = arith.constant 0 : index
    %c0_23 = arith.constant 0 : index
    %40 = vector.load %arg7[%c0_22, %c0_23] : memref<1x128xf32, #tpu.memory_space<vmem>>, vector<1x128xf32>
    %41 = arith.addf %39, %40 : vector<1x128xf32>
    %42 = arith.mulf %29, %41 : vector<1x128xf32>
    %43 = arith.addf %38, %42 : vector<1x128xf32>
    %44 = math.tanh %43 : vector<1x128xf32>
    %45 = arith.subf %17, %44 : vector<1x128xf32>
    %46 = arith.mulf %37, %45 : vector<1x128xf32>
    %47 = arith.addf %44, %46 : vector<1x128xf32>
    %48 = arith.index_cast %c0_i32_15 : i32 to index
    %c0_24 = arith.constant 0 : index
    %49 = vector.load %arg8[%48, %c0_24] : memref<8x128xf32, #tpu.memory_space<vmem>>, vector<1x128xf32>
    tpu.vector_store %arg8[%48, %c0_24], %47 {strides = array<i32>} : memref<8x128xf32, #tpu.memory_space<vmem>>, vector<1x128xf32>,
    %c1_i32_25 = arith.constant 1 : i32
    %c0_26 = arith.constant 0 : index
    %c0_27 = arith.constant 0 : index
    %50 = vector.load %arg9[%c0_26, %c0_27] : memref<1x128xf32, #tpu.memory_space<vmem>>, vector<1x128xf32>
    tpu.vector_store %arg9[%c0_26, %c0_27], %47 {strides = array<i32>} : memref<1x128xf32, #tpu.memory_space<vmem>>, vector<1x128xf32>,
    return
  }
  func.func @transform_0(%arg0: i32, %arg1: memref<1xi32, #tpu.memory_space<smem>>) -> (i32, i32) {
    %c0_i32 = arith.constant 0 : i32
    %c0_i32_0 = arith.constant 0 : i32
    %c0_i32_1 = arith.constant 0 : i32
    return %c0_i32, %c0_i32_0 : i32, i32
  }
  func.func @transform_1(%arg0: i32, %arg1: memref<1xi32, #tpu.memory_space<smem>>) -> (i32, i32) {
    %c0_i32 = arith.constant 0 : i32
    %c0_i32_0 = arith.constant 0 : i32
    %c0_i32_1 = arith.constant 0 : i32
    return %c0_i32, %c0_i32_0 : i32, i32
  }
  func.func @transform_2(%arg0: i32, %arg1: memref<1xi32, #tpu.memory_space<smem>>) -> (i32, i32) {
    %c0_i32 = arith.constant 0 : i32
    %c0_i32_0 = arith.constant 0 : i32
    %c0_i32_1 = arith.constant 0 : i32
    return %c0_i32, %c0_i32_0 : i32, i32
  }
  func.func @transform_3(%arg0: i32, %arg1: memref<1xi32, #tpu.memory_space<smem>>) -> (i32, i32) {
    %c0_i32 = arith.constant 0 : i32
    %c0_i32_0 = arith.constant 0 : i32
    %c0_i32_1 = arith.constant 0 : i32
    return %c0_i32, %c0_i32_0 : i32, i32
  }
  func.func @transform_4(%arg0: i32, %arg1: memref<1xi32, #tpu.memory_space<smem>>) -> (i32, i32) {
    %c0_i32 = arith.constant 0 : i32
    %c0_i32_0 = arith.constant 0 : i32
    %c0_i32_1 = arith.constant 0 : i32
    return %c0_i32, %c0_i32_0 : i32, i32
  }
  func.func @transform_5(%arg0: i32, %arg1: memref<1xi32, #tpu.memory_space<smem>>) -> (i32, i32) {
    %c0_i32 = arith.constant 0 : i32
    %c0_i32_0 = arith.constant 0 : i32
    %c0_i32_1 = arith.constant 0 : i32
    return %c0_i32, %c0_i32_0 : i32, i32
  }
  func.func @transform_6(%arg0: i32, %arg1: memref<1xi32, #tpu.memory_space<smem>>) -> (i32, i32) {
    %c0_i32 = arith.constant 0 : i32
    %c0_i32_0 = arith.constant 0 : i32
    %c0_i32_1 = arith.constant 0 : i32
    return %c0_i32, %c0_i32_0 : i32, i32
  }
  func.func @transform_7(%arg0: i32, %arg1: memref<1xi32, #tpu.memory_space<smem>>) -> (i32, i32) {
    %c0_i32 = arith.constant 0 : i32
    %c0_i32_0 = arith.constant 0 : i32
    %c0_i32_1 = arith.constant 0 : i32
    return %c0_i32, %c0_i32_0 : i32, i32
  }
}

</mosaic_0001>

<bundles_post_ra>
// kernel: tpu_custom_call.1
= control target key start
LH: loop header
LB: loop body
LE: loop exit
PB: predicated region body
PF: predicated region fallthrough
CT: control target
= control target key end

     0   :  { %15 = vsyncpa [#allocation7], 0  ;;  %s1085_s0 = inlined_call_operand.<no memory space> [shape: s32[1], index: 0, kind: input, shape index: {}]   ;;  %s1086_s1 = inlined_call_operand.hbm [shape: f32[16,128], index: 1, kind: input, shape index: {}]   ;;  %s1087_s2 = inlined_call_operand.vmem [shape: f32[1,128], index: 2, kind: input, shape index: {}]   ;;  %s1088_s3 = inlined_call_operand.hbm [shape: f32[128,384], index: 3, kind: input, shape index: {}]   ;;  %s1089_s4 = inlined_call_operand.hbm [shape: f32[128,384], index: 4, kind: input, shape index: {}]   ;;  %s1090_s5 = inlined_call_operand.vmem [shape: f32[1,384], index: 5, kind: input, shape index: {}]   ;;  %s1091_s6 = inlined_call_operand.vmem [shape: f32[1,128], index: 6, kind: input, shape index: {}]   ;;  %s1092_s7 = inlined_call_operand.hbm [shape: f32[8,128], index: 7, kind: output, shape index: {0}]   ;;  %s1093_s8 = inlined_call_operand.hbm [shape: f32[1,128], index: 8, kind: output, shape index: {1}]  }
   0x1   :  { %16 = vsyncpa [#allocation10], 0 }
   0x2   :  { %17 = vsyncpa [#allocation8], 0 }
   0x3   :  { %18 = vsyncpa [#allocation14], 0  ;;  %s905_s27 = smov [#allocation9]   ;;  %s787_s9 = scalar_lea.hbm %s1088_s3, 6144 }
   0x4   :  { %s38_s28 = sshll.u32 %s905_s27, 4  ;;  %p788_p0 = scmp.ne.s32.totalorder %s1088_s3, %s787_s9  ;;  %s39_s28 = int_to_ptr.vmem [resolvable:$true] %s38_s28 }
   0x5   :  { %p791_p1 = scmp.lt.u32.totalorder %s787_s9, %s1088_s3 }
   0x7   :  { %p793_p2 = pnand %p791_p1, %p788_p0 }
   0x9   :  { %796 = shalt.err (!%p793_p2)
}
   0xa   :  { %s797_s14 = scalar_lea.vmem %s39_s28, 6144  ;;  %p802_p4 = scmp.lt.s32.totalorder %s39_s28, %s39_s28 }
   0xb   :  { %p798_p3 = scmp.ne.s32.totalorder %s39_s28, %s797_s14  ;;  %p803_p5 = scmp.lt.s32.totalorder %s797_s14, %s797_s14 }
   0xd   :  { %p804_p6 = por %p803_p5, %p802_p4 }
   0xf   :  { %p805_p7 = pnand %p804_p6, %p798_p3 }
  0x11   :  { %808 = shalt.err (!%p805_p7)
}
  0x12   :  { %s906_s15 = smov 384   ;;  %s907_s16 = smov 24  }
  0x13   :  { %44 = dma.hbm_to_vmem [thread:$0]  %s1088_s3, 6144, %s39_s28, [#allocation10], %s906_s15, %s906_s15, %s907_s16  }
  0x14   :  { %s908_s19 = smov [#allocation6]   ;;  %s809_s23 = scalar_lea.hbm %s1086_s1, 256 }
  0x15   :  { %s24_s20 = sshll.u32 %s908_s19, 4  ;;  %p810_p8 = scmp.ne.s32.totalorder %s1086_s1, %s809_s23  ;;  %s25_s20 = int_to_ptr.vmem [resolvable:$true] %s24_s20 }
  0x16   :  { %p813_p9 = scmp.lt.u32.totalorder %s809_s23, %s1086_s1 }
  0x18   :  { %p815_p10 = pnand %p813_p9, %p810_p8 }
  0x1a   :  { %818 = shalt.err (!%p815_p10)
}
  0x1b   :  { %s819_s29 = scalar_lea.vmem %s25_s20, 256  ;;  %p824_p12 = scmp.lt.s32.totalorder %s25_s20, %s25_s20 }
  0x1c   :  { %p820_p11 = scmp.ne.s32.totalorder %s25_s20, %s819_s29  ;;  %p825_p13 = scmp.lt.s32.totalorder %s819_s29, %s819_s29 }
  0x1e   :  { %p826_p0 = por %p825_p13, %p824_p12 }
  0x20   :  { %p827_p1 = pnand %p826_p0, %p820_p11 }
  0x22   :  { %830 = shalt.err (!%p827_p1)
}
  0x23   :  { %s909_s3 = smov 128   ;;  %s910_s28 = smov 8  }
  0x24   :  { %30 = dma.hbm_to_vmem [thread:$0]  %s1086_s1, 256, %s25_s20, [#allocation7], %s909_s3, %s909_s3, %s910_s28  }
  0x25   :  { %s911_s10 = smov [#allocation11]   ;;  %s831_s14 = scalar_lea.hbm %s1089_s4, 6144 }
  0x26   :  { %s50_s11 = sshll.u32 %s911_s10, 4  ;;  %p832_p2 = scmp.ne.s32.totalorder %s1089_s4, %s831_s14  ;;  %s51_s11 = int_to_ptr.vmem [resolvable:$true] %s50_s11 }
  0x27   :  { %p835_p3 = scmp.lt.u32.totalorder %s831_s14, %s1089_s4 }
  0x29   :  { %p837_p4 = pnand %p835_p3, %p832_p2 }
  0x2b   :  { %840 = shalt.err (!%p837_p4)
}
  0x2c   :  { %s841_s22 = scalar_lea.vmem %s51_s11, 6144  ;;  %p846_p6 = scmp.lt.s32.totalorder %s51_s11, %s51_s11 }
  0x2d   :  { %p842_p5 = scmp.ne.s32.totalorder %s51_s11, %s841_s22  ;;  %p847_p7 = scmp.lt.s32.totalorder %s841_s22, %s841_s22 }
  0x2f   :  { %p848_p8 = por %p847_p7, %p846_p6 }
  0x31   :  { %p849_p9 = pnand %p848_p8, %p842_p5 }
  0x33   :  { %852 = shalt.err (!%p849_p9)
}
  0x34   :  { %56 = dma.hbm_to_vmem [thread:$0]  %s1089_s4, 6144, %s51_s11, [#allocation10], %s906_s15, %s906_s15, %s907_s16  }
  0x35   :  { %897 = dma.done.wait [#allocation7], 256  }
  0x36   :  { %898 = vsyncadd [#allocation7], 4294967040 }
  0x37   :  { %899 = dma.done.wait [#allocation10], 12288  }
  0x38   :  { %900 = vsyncadd [#allocation10], 4294955008  ;;  %v912_v0 = vmov 0.0|0.0   ;;  %v913_v1 = vmov 0.0   ;;  %vm914_vm0 = vmmov 0   ;;  %v81_v2 = vld [vmem:[#allocation9 + $0x8] sm:$0xff] }
  0x39   :  { %685 = vmatprep.subr.bf16.mxu1 %v912_v0  ;;  %70 = vst [vmem:[#allocation2] sm:$0xff] %v913_v1  ;;  %209 = vmatprep.mubr.f32.mxu0 %v913_v1  ;;  %v84_v3 = vld [vmem:[#allocation9 + $0x20] sm:$0xff]  ;;  %v83_v6 = vld [vmem:[#allocation9 + $0x18] sm:$0xff]  ;;  %v82_v7 = vld [vmem:[#allocation9 + $0x10] sm:$0xff]  ;;  %p72_p10 = scmp.gt.s32.totalorder %s1085_s0, 0  ;;  %p540_p11 = scmp.lt.s32.totalorder %s1085_s0, 15 }
  0x3a   :  { %615 = vmatprep.mubr.msk.f32.mxu1 %vm914_vm0, %v913_v1  ;;  %v80_v4 = vld [vmem:[#allocation9] sm:$0xff]  ;;  %v653_v5 = vpack.c.bf16 %v84_v3, %v81_v2  ;;  %v85_v8 = vld [vmem:[#allocation9 + $0x28] sm:$0xff]  ;;  %v87_v11 = vld [vmem:[#allocation9 + $0x38] sm:$0xff]  ;;  %s915_s12 = smov [#allocation12]   ;;  %s916_s14 = smov [#allocation13]  }
  0x3b   :  { %v655_v9 = vpack.c.bf16 %v83_v6, %v80_v4  ;;  %v686_v10 = vpack.c.bf16 %v85_v8, %v82_v7  ;;  %v90_v12 = vld [vmem:[#allocation9 + $0x50] sm:$0xff]  ;;  %v89_v15 = vld [vmem:[#allocation9 + $0x48] sm:$0xff]  ;;  %v88_v16 = vld [vmem:[#allocation9 + $0x40] sm:$0xff]  ;;  %s73_s29 = scalar_select %p72_p10, %s1085_s0, 0 }
  0x3c   :  { %v86_v13 = vld [vmem:[#allocation9 + $0x30] sm:$0xff]  ;;  %654 = vmatprep.subr.bf16.mxu0 %v653_v5  ;;  %v657_v14 = vpack.c.bf16 %v90_v12, %v87_v11  ;;  %v91_v17 = vld [vmem:[#allocation9 + $0x58] sm:$0xff]  ;;  %v93_v20 = vld [vmem:[#allocation9 + $0x68] sm:$0xff]  ;;  %s515_s13 = sshll.u32 %s915_s12, 4  ;;  %s525_s17 = sshll.u32 %s916_s14, 4  ;;  %s516_s13 = int_to_ptr.vmem [resolvable:$true] %s515_s13  ;;  %s1053_s17 = int_to_ptr.vmem [resolvable:$true] %s525_s17 }
  0x3d   :  { %656 = vmatpush1.bf16.msra.mxu0 %v655_v9  ;;  %687 = vmatpush3.bf16.msra.mxu1 %v686_v10  ;;  %v659_v18 = vpack.c.bf16 %v89_v15, %v86_v13  ;;  %v689_v19 = vpack.c.bf16 %v91_v17, %v88_v16  ;;  %v96_v21 = vld [vmem:[#allocation9 + $0x80] sm:$0xff]  ;;  %v95_v24 = vld [vmem:[#allocation9 + $0x78] sm:$0xff]  ;;  %v94_v25 = vld [vmem:[#allocation9 + $0x70] sm:$0xff]  ;;  %s1095_s29 = smov (!%p540_p11, %s73_s29), 15  ;;  %p858_p13 = scmp.lt.s32.totalorder %s516_s13, %s516_s13 }
  0x3e   :  { %v92_v22 = vld [vmem:[#allocation9 + $0x60] sm:$0xff]  ;;  %658 = vmatprep.subr.bf16.mxu0 %v657_v14  ;;  %688 = vmatprep.subr.bf16.mxu1 %v912_v0  ;;  %v661_v23 = vpack.c.bf16 %v96_v21, %v93_v20  ;;  %v97_v26 = vld [vmem:[#allocation9 + $0x88] sm:$0xff]  ;;  %v99_v27 = vld [vmem:[#allocation9 + $0x98] sm:$0xff]  ;;  %s76_s0 = scalar_lea.vmem [#allocation6], %s1095_s29 }
  0x3f   :  { %v102_v28 = vld [vmem:[#allocation9 + $0xb0] sm:$0xff]  ;;  %v663_v29 = vpack.c.bf16 %v95_v24, %v92_v22  ;;  %v692_v30 = vpack.c.bf16 %v97_v26, %v94_v25  ;;  %v101_v33 = vld [vmem:[#allocation9 + $0xa8] sm:$0xff]  ;;  %v100_v34 = vld [vmem:[#allocation9 + $0xa0] sm:$0xff] }
  0x40   :  { %v98_v31 = vld [vmem:[#allocation9 + $0x90] sm:$0xff]  ;;  %v665_v32 = vpack.c.bf16 %v102_v28, %v99_v27  ;;  %v103_v35 = vld [vmem:[#allocation9 + $0xb8] sm:$0xff]  ;;  %v105_v36 = vld [vmem:[#allocation9 + $0xc8] sm:$0xff] }
  0x41   :  { %660 = vmatpush1.bf16.msra.mxu0 %v659_v18  ;;  %690 = vmatpush3.bf16.msra.mxu1 %v689_v19  ;;  %v108_v37 = vld [vmem:[#allocation9 + $0xe0] sm:$0xff]  ;;  %v667_v38 = vpack.c.bf16 %v101_v33, %v98_v31  ;;  %v695_v39 = vpack.c.bf16 %v103_v35, %v100_v34  ;;  %v107_v42 = vld [vmem:[#allocation9 + $0xd8] sm:$0xff]  ;;  %v106_v43 = vld [vmem:[#allocation9 + $0xd0] sm:$0xff] }
  0x42   :  { %662 = vmatprep.subr.bf16.mxu0 %v661_v23  ;;  %691 = vmatprep.subr.bf16.mxu1 %v912_v0  ;;  %v104_v40 = vld [vmem:[#allocation9 + $0xc0] sm:$0xff]  ;;  %v669_v41 = vpack.c.bf16 %v108_v37, %v105_v36  ;;  %v109_v44 = vld [vmem:[#allocation9 + $0xe8] sm:$0xff]  ;;  %v111_v45 = vld [vmem:[#allocation9 + $0xf8] sm:$0xff] }
  0x43   :  { %v114_v46 = vld [vmem:[#allocation9 + $0x110] sm:$0xff]  ;;  %v671_v47 = vpack.c.bf16 %v107_v42, %v104_v40  ;;  %v698_v48 = vpack.c.bf16 %v109_v44, %v106_v43  ;;  %v113_v52 = vld [vmem:[#allocation9 + $0x108] sm:$0xff]  ;;  %v112_v53 = vld [vmem:[#allocation9 + $0x100] sm:$0xff] }
  0x44   :  { %v110_v49 = vld [vmem:[#allocation9 + $0xf0] sm:$0xff]  ;;  %v673_v51 = vpack.c.bf16 %v114_v46, %v111_v45  ;;  %v115_v54 = vld [vmem:[#allocation9 + $0x118] sm:$0xff]  ;;  %v117_v55 = vld [vmem:[#allocation9 + $0x128] sm:$0xff] }
  0x45   :  { %664 = vmatpush1.bf16.msra.mxu0 %v663_v29  ;;  %693 = vmatpush3.bf16.msra.mxu1 %v692_v30  ;;  %v77_v50 = vld [vmem:[%s76_s0] sm:$0x1]  ;;  %v120_v56 = vld [vmem:[#allocation9 + $0x140] sm:$0xff]  ;;  %v675_v57 = vpack.c.bf16 %v113_v52, %v110_v49  ;;  %v701_v58 = vpack.c.bf16 %v115_v54, %v112_v53  ;;  %v119_v61 = vld [vmem:[#allocation9 + $0x138] sm:$0xff] }
  0x46   :  { %666 = vmatprep.subr.bf16.mxu0 %v665_v32  ;;  %694 = vmatprep.subr.bf16.mxu1 %v912_v0  ;;  %78 = vst [vmem:[#allocation2] sm:$0x1] %v77_v50  ;;  %v116_v59 = vld [vmem:[#allocation9 + $0x120] sm:$0xff]  ;;  %v677_v60 = vpack.c.bf16 %v120_v56, %v117_v55  ;;  %v118_v62 = vld [vmem:[#allocation9 + $0x130] sm:$0xff]  ;;  %v121_v63 = vld [vmem:[#allocation9 + $0x148] sm:$0xff] }
  0x47   :  { %v123_v2 = vld [vmem:[#allocation9 + $0x158] sm:$0xff]  ;;  %v126_v3 = vld [vmem:[#allocation9 + $0x170] sm:$0xff]  ;;  %v679_v4 = vpack.c.bf16 %v119_v61, %v116_v59  ;;  %v704_v5 = vpack.c.bf16 %v121_v63, %v118_v62  ;;  %v125_v8 = vld [vmem:[#allocation9 + $0x168] sm:$0xff] }
  0x48   :  { %v122_v6 = vld [vmem:[#allocation9 + $0x150] sm:$0xff]  ;;  %v681_v7 = vpack.c.bf16 %v126_v3, %v123_v2  ;;  %v124_v9 = vld [vmem:[#allocation9 + $0x160] sm:$0xff]  ;;  %v127_v10 = vld [vmem:[#allocation9 + $0x178] sm:$0xff] }
  0x49   :  { %668 = vmatpush1.bf16.msra.mxu0 %v667_v38  ;;  %696 = vmatpush3.bf16.msra.mxu1 %v695_v39  ;;  %v292_v11 = vld [vmem:[#allocation11 + $0x8] sm:$0xff]  ;;  %v295_v12 = vld [vmem:[#allocation11 + $0x20] sm:$0xff]  ;;  %v683_v13 = vpack.c.bf16 %v125_v8, %v122_v6  ;;  %v707_v14 = vpack.c.bf16 %v127_v10, %v124_v9  ;;  %v294_v17 = vld [vmem:[#allocation11 + $0x18] sm:$0xff] }
  0x4a   :  { %670 = vmatprep.subr.bf16.mxu0 %v669_v41  ;;  %697 = vmatprep.subr.bf16.mxu1 %v912_v0  ;;  %v291_v15 = vld [vmem:[#allocation11] sm:$0xff]  ;;  %v709_v16 = vpack.c.bf16 %v295_v12, %v292_v11  ;;  %v293_v18 = vld [vmem:[#allocation11 + $0x10] sm:$0xff]  ;;  %v296_v19 = vld [vmem:[#allocation11 + $0x28] sm:$0xff] }
  0x4b   :  { %v298_v20 = vld [vmem:[#allocation11 + $0x38] sm:$0xff]  ;;  %v301_v21 = vld [vmem:[#allocation11 + $0x50] sm:$0xff]  ;;  %v711_v23 = vpack.c.bf16 %v294_v17, %v291_v15  ;;  %v742_v25 = vpack.c.bf16 %v296_v19, %v293_v18  ;;  %v300_v27 = vld [vmem:[#allocation11 + $0x48] sm:$0xff] }
  0x4c   :  { %v297_v24 = vld [vmem:[#allocation11 + $0x30] sm:$0xff]  ;;  %v713_v26 = vpack.c.bf16 %v301_v21, %v298_v20  ;;  %v299_v28 = vld [vmem:[#allocation11 + $0x40] sm:$0xff]  ;;  %v302_v29 = vld [vmem:[#allocation11 + $0x58] sm:$0xff] }
  0x4d   :  { %672 = vmatpush1.bf16.msra.mxu0 %v671_v47  ;;  %699 = vmatpush3.bf16.msra.mxu1 %v698_v48  ;;  %v79_v22 = vld [vmem:[#allocation2] sm:$0xff]  ;;  %v304_v30 = vld [vmem:[#allocation11 + $0x68] sm:$0xff]  ;;  %v307_v31 = vld [vmem:[#allocation11 + $0x80] sm:$0xff]  ;;  %v715_v32 = vpack.c.bf16 %v300_v27, %v297_v24  ;;  %v745_v34 = vpack.c.bf16 %v302_v29, %v299_v28  ;;  %v130_v24 = vlaneseq }
  0x4e   :  { %674 = vmatprep.subr.bf16.mxu0 %v673_v51  ;;  %700 = vmatprep.subr.bf16.mxu1 %v912_v0  ;;  %v303_v33 = vld [vmem:[#allocation11 + $0x60] sm:$0xff]  ;;  %v717_v35 = vpack.c.bf16 %v307_v31, %v304_v30  ;;  %v306_v36 = vld [vmem:[#allocation11 + $0x78] sm:$0xff]  ;;  %v305_v37 = vld [vmem:[#allocation11 + $0x70] sm:$0xff] }
  0x4f   :  { %v308_v38 = vld [vmem:[#allocation11 + $0x88] sm:$0xff]  ;;  %v310_v39 = vld [vmem:[#allocation11 + $0x98] sm:$0xff]  ;;  %v313_v40 = vld [vmem:[#allocation11 + $0xb0] sm:$0xff]  ;;  %v719_v41 = vpack.c.bf16 %v306_v36, %v303_v33 }
  0x50   :  { %v309_v42 = vld [vmem:[#allocation11 + $0x90] sm:$0xff]  ;;  %v748_v43 = vpack.c.bf16 %v308_v38, %v305_v37  ;;  %v721_v44 = vpack.c.bf16 %v313_v40, %v310_v39  ;;  %v312_v45 = vld [vmem:[#allocation11 + $0xa8] sm:$0xff]  ;;  %v311_v46 = vld [vmem:[#allocation11 + $0xa0] sm:$0xff] }
  0x51   :  { %676 = vmatpush1.bf16.msra.mxu0 %v675_v57  ;;  %702 = vmatpush3.bf16.msra.mxu1 %v701_v58  ;;  %v314_v47 = vld [vmem:[#allocation11 + $0xb8] sm:$0xff]  ;;  %v316_v48 = vld [vmem:[#allocation11 + $0xc8] sm:$0xff]  ;;  %v319_v49 = vld [vmem:[#allocation11 + $0xe0] sm:$0xff]  ;;  %v723_v50 = vpack.c.bf16 %v312_v45, %v309_v42 }
  0x52   :  { %678 = vmatprep.subr.bf16.mxu0 %v677_v60  ;;  %703 = vmatprep.subr.bf16.mxu1 %v912_v0  ;;  %v315_v51 = vld [vmem:[#allocation11 + $0xc0] sm:$0xff]  ;;  %v751_v52 = vpack.c.bf16 %v314_v47, %v311_v46  ;;  %v318_v53 = vld [vmem:[#allocation11 + $0xd8] sm:$0xff]  ;;  %v317_v54 = vld [vmem:[#allocation11 + $0xd0] sm:$0xff] }
  0x53   :  { %v320_v55 = vld [vmem:[#allocation11 + $0xe8] sm:$0xff]  ;;  %v322_v56 = vld [vmem:[#allocation11 + $0xf8] sm:$0xff]  ;;  %v325_v57 = vld [vmem:[#allocation11 + $0x110] sm:$0xff]  ;;  %v727_v58 = vpack.c.bf16 %v318_v53, %v315_v51 }
  0x54   :  { %v321_v59 = vld [vmem:[#allocation11 + $0xf0] sm:$0xff]  ;;  %v754_v60 = vpack.c.bf16 %v320_v55, %v317_v54  ;;  %v729_v61 = vpack.c.bf16 %v325_v57, %v322_v56  ;;  %v324_v62 = vld [vmem:[#allocation11 + $0x108] sm:$0xff]  ;;  %v323_v63 = vld [vmem:[#allocation11 + $0x100] sm:$0xff] }
  0x55   :  { %680 = vmatpush1.bf16.msra.mxu0 %v679_v4  ;;  %705 = vmatpush3.bf16.msra.mxu1 %v704_v5  ;;  %v326_v2 = vld [vmem:[#allocation11 + $0x118] sm:$0xff]  ;;  %v328_v3 = vld [vmem:[#allocation11 + $0x128] sm:$0xff]  ;;  %v331_v4 = vld [vmem:[#allocation11 + $0x140] sm:$0xff]  ;;  %v731_v5 = vpack.c.bf16 %v324_v62, %v321_v59 }
  0x56   :  { %682 = vmatprep.subr.bf16.mxu0 %v681_v7  ;;  %706 = vmatprep.subr.bf16.mxu1 %v912_v0  ;;  %v327_v6 = vld [vmem:[#allocation11 + $0x120] sm:$0xff]  ;;  %v757_v7 = vpack.c.bf16 %v326_v2, %v323_v63  ;;  %v733_v8 = vpack.c.bf16 %v331_v4, %v328_v3  ;;  %v330_v9 = vld [vmem:[#allocation11 + $0x138] sm:$0xff]  ;;  %v329_v10 = vld [vmem:[#allocation11 + $0x130] sm:$0xff] }
  0x57   :  { %v332_v11 = vld [vmem:[#allocation11 + $0x148] sm:$0xff]  ;;  %v334_v12 = vld [vmem:[#allocation11 + $0x158] sm:$0xff]  ;;  %v333_v15 = vld [vmem:[#allocation11 + $0x150] sm:$0xff] }
  0x58   :  { %v336_v18 = vld [vmem:[#allocation11 + $0x168] sm:$0xff]  ;;  %v335_v19 = vld [vmem:[#allocation11 + $0x160] sm:$0xff]  ;;  %v338_v20 = vld [vmem:[#allocation11 + $0x178] sm:$0xff] }
  0x59   :  { %684 = vmatpush1.bf16.msra.mxu0 %v683_v13  ;;  %708 = vmatpush3.bf16.msra.mxu1 %v707_v14  ;;  %v337_v13 = vld [vmem:[#allocation11 + $0x170] sm:$0xff]  ;;  %v735_v14 = vpack.c.bf16 %v330_v9, %v327_v6  ;;  %v739_v21 = vpack.c.bf16 %v336_v18, %v333_v15 }
  0x5a   :  { %710 = vmatprep.subr.bf16.mxu0 %v709_v16  ;;  %741 = vmatprep.subr.bf16.mxu1 %v912_v0  ;;  %v760_v16 = vpack.c.bf16 %v332_v11, %v329_v10  ;;  %v737_v17 = vpack.c.bf16 %v337_v13, %v334_v12  ;;  %v128_v28 = vld [vmem:[%s1090_s5] sm:$0x7] }
  0x5b   :  { %v497_v51 = vld [vmem:[%s1091_s6] sm:$0x1]  ;;  %s853_s6 = scalar_lea.vmem %s516_s13, 128 }
  0x5c   :  { %210 = vmatmul.mubr.f32.vlgmr.msra.gmra.mrb[0].mxu0 %v79_v22  ;;  %616 = vmatmul.mubr.f32.vlgmr.msra.gmra.mrb[0].mxu1 %v79_v22  ;;  %v763_v22 = vpack.c.bf16 %v338_v20, %v335_v19  ;;  %p854_p12 = scmp.ne.s32.totalorder %s516_s13, %s853_s6  ;;  %p859_p0 = scmp.lt.s32.totalorder %s853_s6, %s853_s6 }
  0x5d   :  { %712 = vmatpush1.bf16.msra.mxu0 %v711_v23  ;;  %743 = vmatpush3.bf16.msra.mxu1 %v742_v25  ;;  %v289_v23 = vld [vmem:[%s1087_s2] sm:$0x1]  ;;  %v131_v25 = vshrl.u32 %v130_v24, 7 }
  0x5e   :  { %714 = vmatprep.subr.bf16.mxu0 %v713_v26  ;;  %744 = vmatprep.subr.bf16.mxu1 %v912_v0  ;;  %p860_p1 = por %p859_p0, %p858_p13 }
  0x5f   :  { %403 = vmatprep.mubr.f32.mxu0 %v913_v1  ;;  %650 = vmatprep.mubr.msk.f32.mxu1 %vm914_vm0, %v913_v1  ;;  %v725_v1 = vpack.c.bf16 %v319_v49, %v316_v48  ;;  %v132_v26 = vsub.s32 0, %v131_v25  ;;  %v140_v27 = vsub.s32 2, %v131_v25  ;;  %v136_v29 = vsub.s32 1, %v131_v25 }
  0x60   :  { %p861_p2 = pnand %p860_p1, %p854_p12 }
  0x61   :  { %716 = vmatpush1.bf16.msra.mxu0 %v715_v32  ;;  %746 = vmatpush3.bf16.msra.mxu1 %v745_v34  ;;  %v133_v30 = vrot.slane %v128_v28, %v132_v26  ;;  %v141_v31 = vrot.slane %v128_v28, %v140_v27 }
  0x62   :  { %718 = vmatprep.subr.bf16.mxu0 %v717_v35  ;;  %747 = vmatprep.subr.bf16.mxu1 %v912_v0 }
  0x65   :  { %720 = vmatpush1.bf16.msra.mxu0 %v719_v41  ;;  %749 = vmatpush3.bf16.msra.mxu1 %v748_v43 }
  0x66   :  { %722 = vmatprep.subr.bf16.mxu0 %v721_v44  ;;  %750 = vmatprep.subr.bf16.mxu1 %v912_v0 }
  0x69   :  { %724 = vmatpush1.bf16.msra.mxu0 %v723_v50  ;;  %752 = vmatpush3.bf16.msra.mxu1 %v751_v52 }
  0x6a   :  { %726 = vmatprep.subr.bf16.mxu0 %v725_v1  ;;  %753 = vmatprep.subr.bf16.mxu1 %v912_v0 }
  0x6d   :  { %728 = vmatpush1.bf16.msra.mxu0 %v727_v58  ;;  %755 = vmatpush3.bf16.msra.mxu1 %v754_v60 }
  0x6e   :  { %730 = vmatprep.subr.bf16.mxu0 %v729_v61  ;;  %756 = vmatprep.subr.bf16.mxu1 %v912_v0 }
  0x71   :  { %732 = vmatpush1.bf16.msra.mxu0 %v731_v5  ;;  %758 = vmatpush3.bf16.msra.mxu1 %v757_v7 }
  0x72   :  { %734 = vmatprep.subr.bf16.mxu0 %v733_v8  ;;  %759 = vmatprep.subr.bf16.mxu1 %v912_v0 }
  0x75   :  { %736 = vmatpush1.bf16.msra.mxu0 %v735_v14  ;;  %761 = vmatpush3.bf16.msra.mxu1 %v760_v16 }
  0x76   :  { %738 = vmatprep.subr.bf16.mxu0 %v737_v17  ;;  %762 = vmatprep.subr.bf16.mxu1 %v912_v0  ;;  %v137_v0 = vrot.slane %v128_v28, %v136_v29 }
  0x79   :  { %740 = vmatpush1.bf16.msra.mxu0 %v739_v21  ;;  %764 = vmatpush3.bf16.msra.mxu1 %v763_v22 }
  0x7c   :  { %404 = vmatmul.mubr.f32.vlgmr.msra.gmra.mrb[2].mxu0 %v289_v23  ;;  %651 = vmatmul.mubr.f32.vlgmr.msra.gmra.mrb[2].mxu1 %v289_v23 }
 0x12f   :  { %v211_v32 = vpop.f32.mrb[0].mxu0  ;;  %v282_v33 = vpop.f32.mrb[0].mxu1 }
 0x130   :  { %v212_v34 = vadd.f32 %v211_v32, %v133_v30  ;;  %v213_v35 = vpop.f32.mrb[1].mxu0  ;;  %v283_v36 = vadd.f32 %v282_v33, %v141_v31  ;;  %v617_v37 = vpop.f32.mrb[1].mxu1 }
 0x131   :  { %v214_v38 = vadd.f32 %v213_v35, %v137_v0 }
 0x132   :  { %286 = vst [vmem:[#allocation3] sm:$0xff] %v212_v34  ;;  %288 = vst [vmem:[#allocation3 + $0x10] sm:$0xff] %v283_v36 }
 0x133   :  { %287 = vst [vmem:[#allocation3 + $0x8] sm:$0xff] %v214_v38 }
 0x13a   :  { %v290_v39 = vld [vmem:[#allocation3] ss:$8 sm:$0x7] }
 0x13b   :  { %v488_v46 = vrot.slane %v290_v39, 1  ;;  %v500_v54 = vrot.slane %v290_v39, 2 }
 0x14f   :  { %v405_v40 = vpop.f32.mrb[2].mxu0  ;;  %v476_v41 = vpop.f32.mrb[2].mxu1 }
 0x150   :  { %v480_v42 = vadd.f32 %v405_v40, %v290_v39  ;;  %v407_v43 = vpop.f32.mrb[3].mxu0  ;;  %v652_v44 = vpop.f32.mrb[3].mxu1  ;;  %v498_v52 = vadd.f32 %v497_v51, %v476_v41 }
 0x151   :  { %v490_v47 = vadd.f32 %v488_v46, %v407_v43 }
 0x152   :  { %v545_v45 = vmul.f32 -1.442695, %v480_v42 }
 0x153   :  { %v546_v48 = vmul.f32 -1.442695, %v490_v47 }
 0x154   :  { %777 = vpow2.f32 %v545_v45 }
 0x155   :  { %779 = vpow2.f32 %v546_v48 }
 0x15e   :  { %v778_v49 = vpop.eup %777 }
 0x15f   :  { %v484_v50 = vadd.f32 1.0, %v778_v49  ;;  %v780_v1 = vpop.eup %779 }
 0x160   :  { %v494_v56 = vadd.f32 1.0, %v780_v1 }
 0x161   :  { %781 = vrcp.f32 %v484_v50 }
 0x16b   :  { %v782_v53 = vpop.eup %781 }
 0x16c   :  { %v499_v55 = vmul.f32 %v782_v53, %v498_v52 }
 0x16e   :  { %v502_v57 = vadd.f32 %v500_v54, %v499_v55 }
 0x170   :  { %783 = vtanh.f32 %v502_v57 }
 0x171   :  { %785 = vrcp.f32 %v494_v56 }
 0x17a   :  { %v784_v58 = vpop.eup %783 }
 0x17b   :  { %v504_v59 = vsub.f32 %v289_v23, %v784_v58  ;;  %v786_v60 = vpop.eup %785 }
 0x17d   :  { %v505_v61 = vmul.f32 %v786_v60, %v504_v59 }
 0x17f   :  { %v506_v62 = vadd.f32 %v784_v58, %v505_v61 }
 0x181   :  { %507 = vst [vmem:[#allocation12] sm:$0x1] %v506_v62  ;;  %508 = vst [vmem:[#allocation13] sm:$0x1] %v506_v62 }
 0x182   :  { %864 = shalt.err (!%p861_p2)
}
 0x183   :  { %s865_s21 = scalar_lea.hbm %s1092_s7, 128 }
 0x184   :  { %p866_p3 = scmp.ne.s32.totalorder %s1092_s7, %s865_s21  ;;  %p869_p4 = scmp.lt.u32.totalorder %s865_s21, %s1092_s7 }
 0x186   :  { %p871_p5 = pnand %p869_p4, %p866_p3 }
 0x188   :  { %874 = shalt.err (!%p871_p5)
}
 0x189   :  { %518 = dma.vmem_to_hbm [thread:$0]  %s516_s13, 128, %s1092_s7, [#allocation8]  }
 0x18a   :  { %s875_s23 = scalar_lea.vmem %s1053_s17, 16  ;;  %s879_s24 = scalar_lea.vmem %s1053_s17, 32 }
 0x18b   :  { %p876_p6 = scmp.ne.s32.totalorder %s1053_s17, %s875_s23  ;;  %p880_p7 = scmp.lt.s32.totalorder %s1053_s17, %s1053_s17 }
 0x18c   :  { %p881_p8 = scmp.lt.s32.totalorder %s879_s24, %s875_s23 }
 0x18e   :  { %p882_p9 = por %p881_p8, %p880_p7 }
 0x190   :  { %p883_p10 = pnand %p882_p9, %p876_p6 }
 0x192   :  { %886 = shalt.err (!%p883_p10)
}
 0x193   :  { %s887_s27 = scalar_lea.hbm %s1093_s8, 16 }
 0x194   :  { %p888_p11 = scmp.ne.s32.totalorder %s1093_s8, %s887_s27  ;;  %p891_p12 = scmp.lt.u32.totalorder %s887_s27, %s1093_s8 }
 0x196   :  { %p893_p13 = pnand %p891_p12, %p888_p11 }
 0x198   :  { %896 = shalt.err (!%p893_p13)
}
 0x199   :  { %528 = dma.vmem_to_hbm [thread:$0]  %s1053_s17, 16, %s1093_s8, [#allocation14]  }
 0x19a   :  { %901 = dma.done.wait [#allocation8], 128  }
 0x19b   :  { %902 = vsyncadd [#allocation8], 4294967168 }
 0x19c   :  { %903 = dma.done.wait [#allocation14], 16  }
 0x19d   :  { %904 = vsyncadd [#allocation14], 4294967280 }
 0x19e   :  { %535 = vsyncpa [#allocation7], 1 }
 0x19f   :  { %536 = vsyncpa [#allocation10], 1 }
 0x1a0   :  { %537 = vsyncpa [#allocation8], 1 }
 0x1a1   :  { %538 = vsyncpa [#allocation14], 1 }

</bundles_post_ra>
